<compile_context>
chip_gen: v6e
topology: v6e:2x2x1
jax: 0.10.0
libtpu: 0.0.40
codegen_flags: <defaults>
</compile_context>

<pallas_src>
import jax
import jax.numpy as jnp
from jax.experimental import pallas as pl
from jax.experimental.pallas import tpu as pltpu


def _round_up(x, m):
    return ((x + m - 1) // m) * m


def policy_kernel(x_ref, w1_ref, b1_ref, w2_ref, b2_ref, o_ref):
    # Hidden layer: bf16 MXU matmul with f32 accumulation, then bias.
    x = x_ref[...].astype(jnp.bfloat16)
    h = jnp.dot(x, w1_ref[...], preferred_element_type=jnp.float32) + b1_ref[...]
    # Dropout (eval mode) == identity, then ReLU (VPU elementwise).
    h = jnp.maximum(h, 0.0)
    # Output layer over the lane-dense (padded-to-128) action axis.
    s = jnp.dot(h.astype(jnp.bfloat16), w2_ref[...],
                preferred_element_type=jnp.float32) + b2_ref[...]
    # Numerically-stable softmax over the actions axis (dim=1 in PyTorch).
    # Padded action columns carry bias -1e30 -> exp == 0 -> they never
    # contribute to max or denom.
    m = jnp.max(s, axis=-1, keepdims=True)
    e = jnp.exp(s - m)
    denom = jnp.sum(e, axis=-1, keepdims=True)
    o_ref[...] = e * pl.reciprocal(denom, approx=True)


def policy_forward(x, w1, b1, w2, b2):
    """x: [B, F] f32, w1: [F, H], b1: [1, H], w2: [H, A], b2: [1, A] -> probs [B, A]."""
    B, F = x.shape
    H = w1.shape[1]
    A = w2.shape[1]

    # Lane-dense padded action axis (multiple of 128).
    A_pad = _round_up(max(A, 128), 128)
    # Batch tile: multiple of 8, capped at 256 rows per grid step.
    TB = min(256, _round_up(B, 8))
    B_pad = _round_up(B, TB)
    grid = (B_pad // TB,)

    # Wrapper-side parameter prep (cheap, fused by XLA):
    #   - pre-cast weights to bf16 (halves weight DMA, native MXU dtype)
    #   - pad w2 columns with zeros, b2 columns with -1e30 so padded actions
    #     vanish under softmax.
    w1_b = w1.astype(jnp.bfloat16)
    w2_p = jnp.zeros((H, A_pad), jnp.bfloat16).at[:, :A].set(w2.astype(jnp.bfloat16))
    b2_p = jnp.full((1, A_pad), -1e30, jnp.float32).at[:, :A].set(b2.astype(jnp.float32))
    b1_f = b1.astype(jnp.float32)

    x_p = x if B_pad == B else jnp.pad(x, ((0, B_pad - B), (0, 0)))

    out = pl.pallas_call(
        policy_kernel,
        out_shape=jax.ShapeDtypeStruct((B_pad, A_pad), jnp.float32),
        grid=grid,
        in_specs=[
            pl.BlockSpec((TB, F), lambda i: (i, 0)),        # x: tiled over batch
            pl.BlockSpec((F, H), lambda i: (0, 0)),         # weights stay resident
            pl.BlockSpec((1, H), lambda i: (0, 0)),
            pl.BlockSpec((H, A_pad), lambda i: (0, 0)),
            pl.BlockSpec((1, A_pad), lambda i: (0, 0)),
        ],
        out_specs=pl.BlockSpec((TB, A_pad), lambda i: (i, 0)),
        compiler_params=pltpu.CompilerParams(
            dimension_semantics=("parallel",),              # megacore-shard the batch
        ),
    )(x_p, w1_b, b1_f, w2_p, b2_p)

    return out[:B, :A]


def init_params(key, n_features, n_actions, hidden=128):
    """Deterministic synthetic parameters (PyTorch Linear shapes, stored [in, out])."""
    k1, k2, k3, k4 = jax.random.split(key, 4)
    lim1 = 1.0 / jnp.sqrt(n_features)
    lim2 = 1.0 / jnp.sqrt(hidden)
    w1 = jax.random.uniform(k1, (n_features, hidden), jnp.float32, -lim1, lim1)
    b1 = jax.random.uniform(k2, (1, hidden), jnp.float32, -lim1, lim1)
    w2 = jax.random.uniform(k3, (hidden, n_actions), jnp.float32, -lim2, lim2)
    b2 = jax.random.uniform(k4, (1, n_actions), jnp.float32, -lim2, lim2)
    return w1, b1, w2, b2


if __name__ == "__main__":
    key = jax.random.PRNGKey(0)
    kx, kp = jax.random.split(key)

    # Many environment steps batched into one call (feedback: don't launch a
    # pallas_call per B=8 step). 512 rows -> 2 parallel grid steps of 256.
    batch = 512
    n_features = 32
    n_actions = 8

    x = jax.random.normal(kx, (batch, n_features), dtype=jnp.float32)
    w1, b1, w2, b2 = init_params(kp, n_features, n_actions)

    probs = jax.jit(policy_forward)(x, w1, b1, w2, b2)
    probs = jax.block_until_ready(probs)

    # Reference 1: same bf16-input / f32-accumulate path in plain JAX.
    xb = x.astype(jnp.bfloat16)
    h_ref = jnp.maximum(
        jnp.dot(xb, w1.astype(jnp.bfloat16), preferred_element_type=jnp.float32) + b1,
        0.0)
    s_ref = jnp.dot(h_ref.astype(jnp.bfloat16), w2.astype(jnp.bfloat16),
                    preferred_element_type=jnp.float32) + b2
    probs_ref = jax.nn.softmax(s_ref, axis=1)

    # Reference 2: pure-f32 eval-mode forward (semantic check, looser tol).
    h_f32 = jnp.maximum(x @ w1 + b1, 0.0)
    probs_f32 = jax.nn.softmax(h_f32 @ w2 + b2, axis=1)

    assert probs.shape == (batch, n_actions)
    # approx EUP reciprocal -> ~1e-3 relative on the normalization.
    assert jnp.allclose(probs, probs_ref, atol=5e-3, rtol=5e-3)
    assert jnp.allclose(probs, probs_f32, atol=2e-2, rtol=2e-2)
    assert jnp.allclose(jnp.sum(probs, axis=1), 1.0, atol=5e-3)

    print("KERNEL_OK")
</pallas_src>

<mosaic_0001>
module attributes {stable_mosaic.version = 11 : i64} {
  func.func @policy_kernel(%arg0: i32, %arg1: memref<256x32xf32, #tpu.memory_space<vmem>>, %arg2: memref<32x128xbf16, #tpu.memory_space<vmem>>, %arg3: memref<1x128xf32, #tpu.memory_space<vmem>>, %arg4: memref<128x128xbf16, #tpu.memory_space<vmem>>, %arg5: memref<1x128xf32, #tpu.memory_space<vmem>>, %arg6: memref<256x128xf32, #tpu.memory_space<vmem>>) attributes {dimension_semantics = [#tpu.dimension_semantics<parallel>], iteration_bounds = array<i64: 2>, scalar_prefetch = 0 : i64, scratch_operands = 0 : i64, tpu.core_type = #tpu.core_type<tc>, window_params = [{transform_indices = @transform_0, window_bounds = array<i64: 256, 32>}, {pipeline_mode = #tpu.pipeline_mode<synchronous>, transform_indices = @transform_1, window_bounds = array<i64: 32, 128>}, {pipeline_mode = #tpu.pipeline_mode<synchronous>, transform_indices = @transform_2, window_bounds = array<i64: 1, 128>}, {pipeline_mode = #tpu.pipeline_mode<synchronous>, transform_indices = @transform_3, window_bounds = array<i64: 128, 128>}, {pipeline_mode = #tpu.pipeline_mode<synchronous>, transform_indices = @transform_4, window_bounds = array<i64: 1, 128>}, {transform_indices = @transform_5, window_bounds = array<i64: 256, 128>}]} {
    %c0 = arith.constant 0 : index
    %c0_0 = arith.constant 0 : index
    %0 = vector.load %arg1[%c0, %c0_0] : memref<256x32xf32, #tpu.memory_space<vmem>>, vector<256x32xf32>
    %1 = arith.truncf %0 : vector<256x32xf32> to vector<256x32xbf16>
    %c0_1 = arith.constant 0 : index
    %c0_2 = arith.constant 0 : index
    %2 = vector.load %arg2[%c0_1, %c0_2] : memref<32x128xbf16, #tpu.memory_space<vmem>>, vector<32x128xbf16>
    %cst = arith.constant dense<0.000000e+00> : vector<256x128xf32>
    %3 = tpu.matmul %1, %2, %cst {dimension_numbers = #tpu.dot_dimension_numbers<[1], [0], [0], [1], [0, 0, 1, 1], [], []>} : vector<256x32xbf16>, vector<32x128xbf16>, vector<256x128xf32> -> vector<256x128xf32>
    %c0_3 = arith.constant 0 : index
    %c0_4 = arith.constant 0 : index
    %4 = vector.load %arg3[%c0_3, %c0_4] : memref<1x128xf32, #tpu.memory_space<vmem>>, vector<1x128xf32>
    %5 = vector.broadcast %4 : vector<1x128xf32> to vector<256x128xf32>
    %6 = arith.addf %3, %5 : vector<256x128xf32>
    %cst_5 = arith.constant 0.000000e+00 : f32
    %7 = vector.broadcast %cst_5 : f32 to vector<256x128xf32>
    %8 = arith.maximumf %6, %7 : vector<256x128xf32>
    %9 = arith.truncf %8 : vector<256x128xf32> to vector<256x128xbf16>
    %c0_6 = arith.constant 0 : index
    %c0_7 = arith.constant 0 : index
    %10 = vector.load %arg4[%c0_6, %c0_7] : memref<128x128xbf16, #tpu.memory_space<vmem>>, vector<128x128xbf16>
    %cst_8 = arith.constant dense<0.000000e+00> : vector<256x128xf32>
    %11 = tpu.matmul %9, %10, %cst_8 {dimension_numbers = #tpu.dot_dimension_numbers<[1], [0], [0], [1], [0, 0, 1, 1], [], []>} : vector<256x128xbf16>, vector<128x128xbf16>, vector<256x128xf32> -> vector<256x128xf32>
    %c0_9 = arith.constant 0 : index
    %c0_10 = arith.constant 0 : index
    %12 = vector.load %arg5[%c0_9, %c0_10] : memref<1x128xf32, #tpu.memory_space<vmem>>, vector<1x128xf32>
    %13 = vector.broadcast %12 : vector<1x128xf32> to vector<256x128xf32>
    %14 = arith.addf %11, %13 : vector<256x128xf32>
    %cst_11 = arith.constant dense<0xFF800000> : vector<256xf32>
    %15 = vector.multi_reduction <maximumf>, %14, %cst_11 [1] : vector<256x128xf32> to vector<256xf32>
    %16 = vector.shape_cast %15 : vector<256xf32> to vector<256x1xf32>
    %17 = vector.broadcast %16 : vector<256x1xf32> to vector<256x128xf32>
    %18 = arith.subf %14, %17 : vector<256x128xf32>
    %19 = math.exp %18 : vector<256x128xf32>
    %cst_12 = arith.constant dense<0.000000e+00> : vector<256xf32>
    %20 = vector.multi_reduction <add>, %19, %cst_12 [1] : vector<256x128xf32> to vector<256xf32>
    %21 = vector.shape_cast %20 : vector<256xf32> to vector<256x1xf32>
    %22 = tpu.reciprocal %21 {approx = true} : vector<256x1xf32> -> vector<256x1xf32>
    %23 = vector.broadcast %22 : vector<256x1xf32> to vector<256x128xf32>
    %24 = arith.mulf %19, %23 : vector<256x128xf32>
    %c0_13 = arith.constant 0 : index
    %c0_14 = arith.constant 0 : index
    %25 = vector.load %arg6[%c0_13, %c0_14] : memref<256x128xf32, #tpu.memory_space<vmem>>, vector<256x128xf32>
    tpu.vector_store %arg6[%c0_13, %c0_14], %24 {strides = array<i32>} : memref<256x128xf32, #tpu.memory_space<vmem>>, vector<256x128xf32>,
    return
  }
  func.func @transform_0(%arg0: i32) -> (i32, i32) {
    %c0_i32 = arith.constant 0 : i32
    %c0_i32_0 = arith.constant 0 : i32
    return %arg0, %c0_i32 : i32, i32
  }
  func.func @transform_1(%arg0: i32) -> (i32, i32) {
    %c0_i32 = arith.constant 0 : i32
    %c0_i32_0 = arith.constant 0 : i32
    %c0_i32_1 = arith.constant 0 : i32
    return %c0_i32, %c0_i32_0 : i32, i32
  }
  func.func @transform_2(%arg0: i32) -> (i32, i32) {
    %c0_i32 = arith.constant 0 : i32
    %c0_i32_0 = arith.constant 0 : i32
    %c0_i32_1 = arith.constant 0 : i32
    return %c0_i32, %c0_i32_0 : i32, i32
  }
  func.func @transform_3(%arg0: i32) -> (i32, i32) {
    %c0_i32 = arith.constant 0 : i32
    %c0_i32_0 = arith.constant 0 : i32
    %c0_i32_1 = arith.constant 0 : i32
    return %c0_i32, %c0_i32_0 : i32, i32
  }
  func.func @transform_4(%arg0: i32) -> (i32, i32) {
    %c0_i32 = arith.constant 0 : i32
    %c0_i32_0 = arith.constant 0 : i32
    %c0_i32_1 = arith.constant 0 : i32
    return %c0_i32, %c0_i32_0 : i32, i32
  }
  func.func @transform_5(%arg0: i32) -> (i32, i32) {
    %c0_i32 = arith.constant 0 : i32
    %c0_i32_0 = arith.constant 0 : i32
    return %arg0, %c0_i32 : i32, i32
  }
}

</mosaic_0001>

<bundles_post_ra>
// kernel: policy_forward.1
= control target key start
LH: loop header
LB: loop body
LE: loop exit
PB: predicated region body
PF: predicated region fallthrough
CT: control target
= control target key end

     0   :  { %s1531_s18 = smov 0   ;;  %s1999_s0 = inlined_call_operand.vmem [shape: f32[512,32], index: 0, kind: input, shape index: {}]   ;;  %s2000_s1 = inlined_call_operand.vmem [shape: bf16[32,128], index: 1, kind: input, shape index: {}]   ;;  %s2001_s2 = inlined_call_operand.vmem [shape: f32[1,128], index: 2, kind: input, shape index: {}]   ;;  %s2002_s3 = inlined_call_operand.vmem [shape: bf16[128,128], index: 3, kind: input, shape index: {}]   ;;  %s2003_s4 = inlined_call_operand.vmem [shape: f32[1,128], index: 4, kind: input, shape index: {}]   ;;  %s2004_s5 = inlined_call_operand.vmem [shape: f32[512,128], index: 5, kind: output, shape index: {}]  }
   0x1 LB: > { %s1166_s19 = sadd.s32 4294967295, %s1499_s18   ;;  %p1170_p0 = scmp.ge.s32.totalorder %s1499_s18, 1  ;;  %s1499_s18 = sphi %s1531_s18, %s15_s18  }
   0x2   : > { %p188_p1 = scmp.lt.s32.totalorder %s1499_s18, 3 }
   0x4   : > { %p189_p2 = pnand %p1170_p0, %p188_p1 }
   0x5   : > { %s1171_s22 = sshll.u32 (!%p189_p2), %s1166_s19, 5 }
   0x6   : > { %192 = sbr.rel (%p189_p2) target bundleno = 798 (0x31e), region = 40  ;;  %p217_p3 = scmp.lt.s32.totalorder (!%p189_p2), %s1171_s22, 63 }
   0xb   : > { %v1355_v0 = vld [vmem:[%s2000_s1 + $0x8] sm:$0xff]   ;;  %v1356_v1 = vld [vmem:[%s2000_s1] sm:$0xff]   ;;  %v1357_v2 = vld [vmem:[%s2002_s3 + $0x38] sm:$0xff]   ;;  %s2006_s22 = smov (!%p217_p3, %s1171_s22), 63  ;;  %vm300_vm0 = vcmask 261120  }
   0xc   : > { %1247 = vmatprep.subr.bf16.mxu0 %v1355_v0  ;;  %v1358_v3 = vld [vmem:[%s2002_s3 + $0x30] sm:$0xff]   ;;  %1331 = vmatprep.subr.bf16.mxu1 %v1357_v2  ;;  %s1172_s29 = sshll.u32 %s2006_s22, 3  ;;  %v1359_v4 = vld [vmem:[%s2002_s3 + $0x28] sm:$0xff]   ;;  %v1360_v16 = vld [vmem:[%s2002_s3 + $0x20] sm:$0xff]  }
   0xd   : > { %1248 = vmatpush3.bf16.msra.mxu0 %v1355_v0  ;;  %1339 = vmatpush3.bf16.msra.mxu1 %v1357_v2  ;;  %s1559_s7 = scalar_lea.vmem %s1999_s0, %s1172_s29  ;;  %v1361_v21 = vld [vmem:[%s2002_s3 + $0x18] sm:$0xff]   ;;  %v1362_v24 = vld [vmem:[%s2002_s3 + $0x10] sm:$0xff]   ;;  %v1363_v29 = vld [vmem:[%s2002_s3 + $0x8] sm:$0xff]   ;;  %s1930_s28 = scalar_lea.vmem %s2004_s5, %s1172_s29 }
   0xe   : > { %1249 = vmatprep.subr.bf16.mxu0 %v1356_v1  ;;  %1332 = vmatprep.subr.bf16.mxu1 %v1358_v3  ;;  %v229_v5 = vld [vmem:[%s1559_s7] sm:$0xff]  ;;  %v230_v6 = vld [vmem:[%s1559_s7 + $0x8] sm:$0xff]  ;;  %v231_v7 = vld [vmem:[%s1559_s7 + $0x10] sm:$0xff] }
   0xf   : > { %v261_v8 = vpack.c.bf16 %v230_v6, %v229_v5  ;;  %v232_v9 = vld [vmem:[%s1559_s7 + $0x18] sm:$0xff]  ;;  %v233_v10 = vld [vmem:[%s1559_s7 + $0x20] sm:$0xff]  ;;  %v234_v11 = vld [vmem:[%s1559_s7 + $0x28] sm:$0xff] }
  0x10   : > { %v262_v12 = vpack.c.bf16 %v232_v9, %v231_v7  ;;  %v263_v13 = vpack.c.bf16 %v234_v11, %v233_v10  ;;  %v235_v14 = vld [vmem:[%s1559_s7 + $0x30] sm:$0xff]  ;;  %v236_v15 = vld [vmem:[%s1559_s7 + $0x38] sm:$0xff]  ;;  %v237_v17 = vld [vmem:[%s1559_s7 + $0x40] sm:$0xff] }
  0x11   : > { %1250 = vmatpush3.bf16.msra.mxu0 %v1356_v1  ;;  %1340 = vmatpush3.bf16.msra.mxu1 %v1358_v3  ;;  %v238_v18 = vld [vmem:[%s1559_s7 + $0x48] sm:$0xff]  ;;  %v264_v19 = vpack.c.bf16 %v236_v15, %v235_v14  ;;  %v239_v22 = vld [vmem:[%s1559_s7 + $0x50] sm:$0xff]  ;;  %v240_v23 = vld [vmem:[%s1559_s7 + $0x58] sm:$0xff] }
  0x12   : > { %1283 = vmatprep.subr.bf16.mxu0 %v1357_v2  ;;  %1251 = vmatprep.mubr.msk.bf16.mxu0 %vm300_vm0, %v261_v8  ;;  %v265_v20 = vpack.c.bf16 %v238_v18, %v237_v17  ;;  %v241_v25 = vld [vmem:[%s1559_s7 + $0x60] sm:$0xff]  ;;  %v242_v26 = vld [vmem:[%s1559_s7 + $0x68] sm:$0xff]  ;;  %v266_v27 = vpack.c.bf16 %v240_v23, %v239_v22  ;;  %v243_v30 = vld [vmem:[%s1559_s7 + $0x70] sm:$0xff] }
  0x13   : > { %1333 = vmatprep.subr.bf16.mxu1 %v1359_v4  ;;  %v267_v28 = vpack.c.bf16 %v242_v26, %v241_v25  ;;  %v244_v31 = vld [vmem:[%s1559_s7 + $0x78] sm:$0xff]  ;;  %v245_v32 = vld [vmem:[%s1559_s7 + $0x80] sm:$0xff]  ;;  %v246_v33 = vld [vmem:[%s1559_s7 + $0x88] sm:$0xff] }
  0x14   : > { %1252 = vmatmul.mubr.msk.bf16.vlgmr.msra.gmra.mxu0 %vm300_vm0, %v262_v12  ;;  %v268_v34 = vpack.c.bf16 %v244_v31, %v243_v30  ;;  %v269_v35 = vpack.c.bf16 %v246_v33, %v245_v32  ;;  %v247_v36 = vld [vmem:[%s1559_s7 + $0x90] sm:$0xff]  ;;  %v248_v37 = vld [vmem:[%s1559_s7 + $0x98] sm:$0xff]  ;;  %v249_v38 = vld [vmem:[%s1559_s7 + $0xa0] sm:$0xff] }
  0x15   : > { %1255 = vmatprep.mubr.msk.bf16.mxu0 %vm300_vm0, %v263_v13  ;;  %1284 = vmatpush3.bf16.msra.mxu0 %v1357_v2  ;;  %v250_v39 = vld [vmem:[%s1559_s7 + $0xa8] sm:$0xff]  ;;  %v270_v40 = vpack.c.bf16 %v248_v37, %v247_v36  ;;  %v251_v42 = vld [vmem:[%s1559_s7 + $0xb0] sm:$0xff]  ;;  %v252_v43 = vld [vmem:[%s1559_s7 + $0xb8] sm:$0xff] }
  0x16   : > { %1285 = vmatprep.subr.bf16.mxu0 %v1358_v3  ;;  %1341 = vmatpush3.bf16.msra.mxu1 %v1359_v4  ;;  %v271_v41 = vpack.c.bf16 %v250_v39, %v249_v38  ;;  %v253_v44 = vld [vmem:[%s1559_s7 + $0xc0] sm:$0xff]  ;;  %v254_v45 = vld [vmem:[%s1559_s7 + $0xc8] sm:$0xff]  ;;  %v272_v46 = vpack.c.bf16 %v252_v43, %v251_v42  ;;  %v255_v48 = vld [vmem:[%s1559_s7 + $0xd0] sm:$0xff] }
  0x17   : > { %1334 = vmatprep.subr.bf16.mxu1 %v1360_v16  ;;  %v273_v47 = vpack.c.bf16 %v254_v45, %v253_v44  ;;  %v256_v49 = vld [vmem:[%s1559_s7 + $0xd8] sm:$0xff]  ;;  %v257_v50 = vld [vmem:[%s1559_s7 + $0xe0] sm:$0xff]  ;;  %v258_v51 = vld [vmem:[%s1559_s7 + $0xe8] sm:$0xff] }
  0x18   : > { %v274_v52 = vpack.c.bf16 %v256_v49, %v255_v48  ;;  %v275_v53 = vpack.c.bf16 %v258_v51, %v257_v50  ;;  %v259_v54 = vld [vmem:[%s1559_s7 + $0xf0] sm:$0xff]  ;;  %v260_v55 = vld [vmem:[%s1559_s7 + $0xf8] sm:$0xff]  ;;  %v1364_v57 = vld [vmem:[%s2002_s3] sm:$0xff]  }
  0x19   : > { %1286 = vmatpush3.bf16.msra.mxu0 %v1358_v3  ;;  %v276_v56 = vpack.c.bf16 %v260_v55, %v259_v54  ;;  %v1630_v60 = vld [vmem:[%s2001_s2] ss:$0 sm:$0xff] }
  0x1a   : > { %1287 = vmatprep.subr.bf16.mxu0 %v1359_v4  ;;  %1342 = vmatpush3.bf16.msra.mxu1 %v1360_v16 }
  0x1b   : > { %1335 = vmatprep.subr.bf16.mxu1 %v1361_v21 }
  0x1c   : > { %1256 = vmatmul.mubr.msk.bf16.gmra.mxu0 %vm300_vm0, %v264_v19 }
  0x1d   : > { %1259 = vmatprep.mubr.msk.bf16.mxu0 %vm300_vm0, %v265_v20  ;;  %1288 = vmatpush3.bf16.msra.mxu0 %v1359_v4 }
  0x1e   : > { %1289 = vmatprep.subr.bf16.mxu0 %v1360_v16  ;;  %1343 = vmatpush3.bf16.msra.mxu1 %v1361_v21 }
  0x1f   : > { %1336 = vmatprep.subr.bf16.mxu1 %v1362_v24 }
  0x21   : > { %1290 = vmatpush3.bf16.msra.mxu0 %v1360_v16 }
  0x22   : > { %1291 = vmatprep.subr.bf16.mxu0 %v1361_v21  ;;  %1344 = vmatpush3.bf16.msra.mxu1 %v1362_v24 }
  0x23   : > { %1337 = vmatprep.subr.bf16.mxu1 %v1363_v29 }
  0x24   : > { %1260 = vmatmul.mubr.msk.bf16.gmra.mxu0 %vm300_vm0, %v266_v27 }
  0x25   : > { %1263 = vmatprep.mubr.msk.bf16.mxu0 %vm300_vm0, %v267_v28  ;;  %1292 = vmatpush3.bf16.msra.mxu0 %v1361_v21 }
  0x26   : > { %1293 = vmatprep.subr.bf16.mxu0 %v1362_v24  ;;  %1345 = vmatpush3.bf16.msra.mxu1 %v1363_v29 }
  0x27   : > { %1338 = vmatprep.subr.bf16.mxu1 %v1364_v57 }
  0x29   : > { %1294 = vmatpush3.bf16.msra.mxu0 %v1362_v24 }
  0x2a   : > { %1295 = vmatprep.subr.bf16.mxu0 %v1363_v29  ;;  %1346 = vmatpush3.bf16.msra.mxu1 %v1364_v57 }
  0x2c   : > { %1264 = vmatmul.mubr.msk.bf16.gmra.mxu0 %vm300_vm0, %v268_v34 }
  0x2d   : > { %1267 = vmatprep.mubr.msk.bf16.mxu0 %vm300_vm0, %v269_v35  ;;  %1296 = vmatpush3.bf16.msra.mxu0 %v1363_v29 }
  0x2e   : > { %1297 = vmatprep.subr.bf16.mxu0 %v1364_v57 }
  0x31   : > { %1298 = vmatpush3.bf16.msra.mxu0 %v1364_v57 }
  0x34   : > { %1268 = vmatmul.mubr.msk.bf16.gmra.mxu0 %vm300_vm0, %v270_v40 }
  0x35   : > { %1271 = vmatprep.mubr.msk.bf16.mxu0 %vm300_vm0, %v271_v41 }
  0x3c   : > { %1272 = vmatmul.mubr.msk.bf16.gmra.mxu0 %vm300_vm0, %v272_v46 }
  0x3d   : > { %1275 = vmatprep.mubr.msk.bf16.mxu0 %vm300_vm0, %v273_v47 }
  0x44   : > { %1276 = vmatmul.mubr.msk.bf16.gmra.mxu0 %vm300_vm0, %v274_v52 }
  0x45   : > { %1279 = vmatprep.mubr.msk.bf16.mxu0 %vm300_vm0, %v275_v53 }
  0x4c   : > { %1280 = vmatmul.mubr.msk.bf16.gmra.mxu0 %vm300_vm0, %v276_v56 }
  0xd4   : > { %v1253_v58 = vpop.f32.mrf.mxu0 }
  0xd5   : > { %v392_v0 = vadd.f32 %v1253_v58, %v1630_v60 }
  0xd6   : > { %v383_v59 = vpop.f32.mrf.mxu0 }
  0xd7   : > { %v384_v62 = vadd.f32 %v1630_v60, %v383_v59  ;;  %v512_v7 = vmax.f32 %v392_v0, 0.0 }
  0xd8   : > { %v1254_v61 = vpop.f32.mrf.mxu0 }
  0xd9   : > { %v395_v63 = vadd.f32 %v1254_v61, %v1630_v60  ;;  %v510_v5 = vmax.f32 %v384_v62, 0.0 }
  0xda   : > { %v386_v1 = vpop.f32.mrf.mxu0 }
  0xdb   : > { %v387_v2 = vadd.f32 %v1630_v60, %v386_v1  ;;  %v513_v3 = vmax.f32 %v395_v63, 0.0 }
  0xdc   : > { %v1257_v4 = vpop.f32.mrf.mxu0 }
  0xdd   : > { %v511_v6 = vmax.f32 %v387_v2, 0.0  ;;  %v543_v10 = vpack.c.bf16 %v513_v3, %v512_v7  ;;  %v408_v14 = vadd.f32 %v1257_v4, %v1630_v60 }
  0xde   : > { %v399_v8 = vpop.f32.mrf.mxu0 }
  0xdf   : > { %v542_v9 = vpack.c.bf16 %v511_v6, %v510_v5  ;;  %v400_v12 = vadd.f32 %v1630_v60, %v399_v8  ;;  %v516_v21 = vmax.f32 %v408_v14, 0.0 }
  0xe0   : > { %v1258_v11 = vpop.f32.mrf.mxu0 }
  0xe1   : > { %v411_v13 = vadd.f32 %v1258_v11, %v1630_v60  ;;  %1299 = vmatprep.mubr.bf16.mxu0 %v542_v9  ;;  %v514_v19 = vmax.f32 %v400_v12, 0.0 }
  0xe2   : > { %v402_v15 = vpop.f32.mrf.mxu0  ;;  %1300 = vmatmul.mubr.bf16.vlgmr.msra.gmra.mxu0 %v543_v10 }
  0xe3   : > { %v403_v16 = vadd.f32 %v1630_v60, %v402_v15  ;;  %v517_v17 = vmax.f32 %v411_v13, 0.0 }
  0xe4   : > { %v1261_v18 = vpop.f32.mrf.mxu0 }
  0xe5   : > { %v515_v20 = vmax.f32 %v403_v16, 0.0  ;;  %v545_v24 = vpack.c.bf16 %v517_v17, %v516_v21  ;;  %v424_v28 = vadd.f32 %v1261_v18, %v1630_v60 }
  0xe6   : > { %v415_v22 = vpop.f32.mrf.mxu0 }
  0xe7   : > { %v544_v23 = vpack.c.bf16 %v515_v20, %v514_v19  ;;  %v416_v26 = vadd.f32 %v1630_v60, %v415_v22  ;;  %v520_v35 = vmax.f32 %v424_v28, 0.0 }
  0xe8   : > { %v1262_v25 = vpop.f32.mrf.mxu0 }
  0xe9   : > { %v427_v27 = vadd.f32 %v1262_v25, %v1630_v60  ;;  %1303 = vmatprep.mubr.bf16.mxu1 %v544_v23  ;;  %v518_v33 = vmax.f32 %v416_v26, 0.0 }
  0xea   : > { %v418_v29 = vpop.f32.mrf.mxu0  ;;  %1304 = vmatmul.mubr.bf16.vlgmr.msra.gmra.mxu1 %v545_v24 }
  0xeb   : > { %v419_v30 = vadd.f32 %v1630_v60, %v418_v29  ;;  %v521_v31 = vmax.f32 %v427_v27, 0.0 }
  0xec   : > { %v1265_v32 = vpop.f32.mrf.mxu0 }
  0xed   : > { %v519_v34 = vmax.f32 %v419_v30, 0.0  ;;  %v547_v38 = vpack.c.bf16 %v521_v31, %v520_v35  ;;  %v440_v42 = vadd.f32 %v1265_v32, %v1630_v60 }
  0xee   : > { %v431_v36 = vpop.f32.mrf.mxu0 }
  0xef   : > { %v546_v37 = vpack.c.bf16 %v519_v34, %v518_v33  ;;  %v432_v40 = vadd.f32 %v1630_v60, %v431_v36  ;;  %v524_v49 = vmax.f32 %v440_v42, 0.0 }
  0xf0   : > { %v1266_v39 = vpop.f32.mrf.mxu0 }
  0xf1   : > { %v443_v41 = vadd.f32 %v1266_v39, %v1630_v60  ;;  %1307 = vmatprep.mubr.bf16.mxu1 %v546_v37  ;;  %v522_v47 = vmax.f32 %v432_v40, 0.0 }
  0xf2   : > { %v434_v43 = vpop.f32.mrf.mxu0  ;;  %1308 = vmatmul.mubr.bf16.gmra.mxu1 %v547_v38 }
  0xf3   : > { %v435_v44 = vadd.f32 %v1630_v60, %v434_v43  ;;  %v525_v45 = vmax.f32 %v443_v41, 0.0 }
  0xf4   : > { %v1269_v46 = vpop.f32.mrf.mxu0 }
  0xf5   : > { %v523_v48 = vmax.f32 %v435_v44, 0.0  ;;  %v549_v52 = vpack.c.bf16 %v525_v45, %v524_v49  ;;  %v456_v56 = vadd.f32 %v1269_v46, %v1630_v60  ;;  %v1667_v44 = vld [vmem:[%s2003_s4] ss:$0 sm:$0xff] }
  0xf6   : > { %v447_v50 = vpop.f32.mrf.mxu0 }
  0xf7   : > { %v548_v51 = vpack.c.bf16 %v523_v48, %v522_v47  ;;  %v448_v54 = vadd.f32 %v1630_v60, %v447_v50  ;;  %v528_v0 = vmax.f32 %v456_v56, 0.0 }
  0xf8   : > { %v1270_v53 = vpop.f32.mrf.mxu0 }
  0xf9   : > { %v459_v55 = vadd.f32 %v1270_v53, %v1630_v60  ;;  %1311 = vmatprep.mubr.bf16.mxu1 %v548_v51  ;;  %v526_v62 = vmax.f32 %v448_v54, 0.0 }
  0xfa   : > { %v450_v57 = vpop.f32.mrf.mxu0  ;;  %1312 = vmatmul.mubr.bf16.gmra.mxu1 %v549_v52 }
  0xfb   : > { %v451_v58 = vadd.f32 %v1630_v60, %v450_v57  ;;  %v529_v59 = vmax.f32 %v459_v55, 0.0 }
  0xfc   : > { %v1273_v61 = vpop.f32.mrf.mxu0 }
  0xfd   : > { %v527_v63 = vmax.f32 %v451_v58, 0.0  ;;  %v551_v3 = vpack.c.bf16 %v529_v59, %v528_v0  ;;  %v472_v7 = vadd.f32 %v1273_v61, %v1630_v60 }
  0xfe   : > { %v463_v1 = vpop.f32.mrf.mxu0 }
  0xff   : > { %v550_v2 = vpack.c.bf16 %v527_v63, %v526_v62  ;;  %v464_v5 = vadd.f32 %v1630_v60, %v463_v1  ;;  %v532_v14 = vmax.f32 %v472_v7, 0.0 }
 0x100   : > { %v1274_v4 = vpop.f32.mrf.mxu0 }
 0x101   : > { %v475_v6 = vadd.f32 %v1274_v4, %v1630_v60  ;;  %1315 = vmatprep.mubr.bf16.mxu1 %v550_v2  ;;  %v530_v12 = vmax.f32 %v464_v5, 0.0 }
 0x102   : > { %v466_v8 = vpop.f32.mrf.mxu0  ;;  %1316 = vmatmul.mubr.bf16.gmra.mxu1 %v551_v3 }
 0x103   : > { %v467_v9 = vadd.f32 %v1630_v60, %v466_v8  ;;  %v533_v10 = vmax.f32 %v475_v6, 0.0 }
 0x104   : > { %v1277_v11 = vpop.f32.mrf.mxu0 }
 0x105   : > { %v531_v13 = vmax.f32 %v467_v9, 0.0  ;;  %v553_v17 = vpack.c.bf16 %v533_v10, %v532_v14  ;;  %v488_v21 = vadd.f32 %v1277_v11, %v1630_v60 }
 0x106   : > { %v479_v15 = vpop.f32.mrf.mxu0 }
 0x107   : > { %v552_v16 = vpack.c.bf16 %v531_v13, %v530_v12  ;;  %v480_v19 = vadd.f32 %v1630_v60, %v479_v15  ;;  %v536_v28 = vmax.f32 %v488_v21, 0.0 }
 0x108   : > { %v1278_v18 = vpop.f32.mrf.mxu0 }
 0x109   : > { %v491_v20 = vadd.f32 %v1278_v18, %v1630_v60  ;;  %1319 = vmatprep.mubr.bf16.mxu1 %v552_v16  ;;  %v534_v26 = vmax.f32 %v480_v19, 0.0 }
 0x10a   : > { %v482_v22 = vpop.f32.mrf.mxu0  ;;  %1320 = vmatmul.mubr.bf16.gmra.mxu1 %v553_v17 }
 0x10b   : > { %v483_v23 = vadd.f32 %v1630_v60, %v482_v22  ;;  %v537_v24 = vmax.f32 %v491_v20, 0.0 }
 0x10c   : > { %v1281_v25 = vpop.f32.mrf.mxu0 }
 0x10d   : > { %v535_v27 = vmax.f32 %v483_v23, 0.0  ;;  %v555_v31 = vpack.c.bf16 %v537_v24, %v536_v28  ;;  %v504_v35 = vadd.f32 %v1281_v25, %v1630_v60 }
 0x10e   : > { %v495_v29 = vpop.f32.mrf.mxu0 }
 0x10f   : > { %v554_v30 = vpack.c.bf16 %v535_v27, %v534_v26  ;;  %v496_v33 = vadd.f32 %v1630_v60, %v495_v29  ;;  %v540_v41 = vmax.f32 %v504_v35, 0.0 }
 0x110   : > { %v1282_v32 = vpop.f32.mrf.mxu0 }
 0x111   : > { %v507_v34 = vadd.f32 %v1282_v32, %v1630_v60  ;;  %1323 = vmatprep.mubr.bf16.mxu1 %v554_v30  ;;  %v538_v39 = vmax.f32 %v496_v33, 0.0 }
 0x112   : > { %v498_v36 = vpop.f32.mrf.mxu0  ;;  %1324 = vmatmul.mubr.bf16.gmra.mxu1 %v555_v31 }
 0x113   : > { %v499_v37 = vadd.f32 %v1630_v60, %v498_v36  ;;  %v541_v38 = vmax.f32 %v507_v34, 0.0 }
 0x115   : > { %v539_v40 = vmax.f32 %v499_v37, 0.0  ;;  %v557_v43 = vpack.c.bf16 %v541_v38, %v540_v41 }
 0x117   : > { %v556_v42 = vpack.c.bf16 %v539_v40, %v538_v39 }
 0x119   : > { %1327 = vmatprep.mubr.bf16.mxu1 %v556_v42 }
 0x11a   : > { %1328 = vmatmul.mubr.bf16.gmra.mxu1 %v557_v43 }
 0x1a2   : > { %v1301_v45 = vpop.f32.mrf.mxu0 }
 0x1a3   : > { %v1670_v46 = vadd.f32 %v1301_v45, %v1667_v44 }
 0x1a4   : > { %v663_v47 = vpop.f32.mrf.mxu0 }
 0x1a5   : > { %v1673_v60 = vadd.f32 %v1667_v44, %v663_v47  ;;  %794 = vmax.xlane.f32.xlu1 %v1670_v46 }
 0x1a6   : > { %v1302_v48 = vpop.f32.mrf.mxu0 }
 0x1a7   : > { %v1677_v49 = vadd.f32 %v1302_v48, %v1667_v44  ;;  %790 = vmax.xlane.f32.xlu0 %v1673_v60 }
 0x1a8   : > { %v666_v50 = vpop.f32.mrf.mxu0 }
 0x1a9   : > { %v1681_v51 = vadd.f32 %v1667_v44, %v666_v50  ;;  %796 = vmax.xlane.f32.xlu1 %v1677_v49 }
 0x1aa   : > { %v1305_v52 = vpop.f32.mrf.mxu1 }
 0x1ab   : > { %792 = vmax.xlane.f32.xlu0 %v1681_v51  ;;  %v1686_v54 = vadd.f32 %v1305_v52, %v1667_v44 }
 0x1ac   : > { %v679_v53 = vpop.f32.mrf.mxu1 }
 0x1ad   : > { %v1693_v58 = vadd.f32 %v1667_v44, %v679_v53 }
 0x1ae   : > { %v1306_v55 = vpop.f32.mrf.mxu1 }
 0x1af   : > { %v1689_v56 = vadd.f32 %v1306_v55, %v1667_v44  ;;  %802 = vmax.xlane.f32.xlu0 %v1686_v54 }
 0x1b0   : > { %v682_v57 = vpop.f32.mrf.mxu1 }
 0x1b1   : > { %804 = vmax.xlane.f32.xlu1 %v1689_v56  ;;  %v1697_v61 = vadd.f32 %v1667_v44, %v682_v57 }
 0x1b2   : > { %v1309_v59 = vpop.f32.mrf.mxu1 }
 0x1b3   : > { %798 = vmax.xlane.f32.xlu0 %v1693_v58  ;;  %v1701_v63 = vadd.f32 %v1309_v59, %v1667_v44 }
 0x1b4   : > { %v695_v62 = vpop.f32.mrf.mxu1 }
 0x1b5   : > { %800 = vmax.xlane.f32.xlu1 %v1697_v61  ;;  %v1709_v3 = vadd.f32 %v1667_v44, %v695_v62 }
 0x1b6   : > { %v1310_v0 = vpop.f32.mrf.mxu1 }
 0x1b7   : > { %v1705_v1 = vadd.f32 %v1310_v0, %v1667_v44  ;;  %810 = vmax.xlane.f32.xlu0 %v1701_v63 }
 0x1b8   : > { %v698_v2 = vpop.f32.mrf.mxu1 }
 0x1b9   : > { %812 = vmax.xlane.f32.xlu1 %v1705_v1  ;;  %v1713_v5 = vadd.f32 %v1667_v44, %v698_v2 }
 0x1ba   : > { %v1313_v4 = vpop.f32.mrf.mxu1 }
 0x1bb   : > { %806 = vmax.xlane.f32.xlu0 %v1709_v3  ;;  %v1717_v7 = vadd.f32 %v1313_v4, %v1667_v44 }
 0x1bc   : > { %v711_v6 = vpop.f32.mrf.mxu1 }
 0x1bd   : > { %808 = vmax.xlane.f32.xlu1 %v1713_v5  ;;  %v1725_v11 = vadd.f32 %v1667_v44, %v711_v6 }
 0x1be   : > { %v1314_v8 = vpop.f32.mrf.mxu1 }
 0x1bf   : > { %v1721_v9 = vadd.f32 %v1314_v8, %v1667_v44  ;;  %818 = vmax.xlane.f32.xlu0 %v1717_v7 }
 0x1c0   : > { %v714_v10 = vpop.f32.mrf.mxu1 }
 0x1c1   : > { %820 = vmax.xlane.f32.xlu1 %v1721_v9  ;;  %v1729_v13 = vadd.f32 %v1667_v44, %v714_v10 }
 0x1c2   : > { %v1317_v12 = vpop.f32.mrf.mxu1 }
 0x1c3   : > { %814 = vmax.xlane.f32.xlu0 %v1725_v11  ;;  %v1733_v15 = vadd.f32 %v1317_v12, %v1667_v44 }
 0x1c4   : > { %v727_v14 = vpop.f32.mrf.mxu1 }
 0x1c5   : > { %816 = vmax.xlane.f32.xlu1 %v1729_v13  ;;  %v1741_v19 = vadd.f32 %v1667_v44, %v727_v14 }
 0x1c6   : > { %v1318_v16 = vpop.f32.mrf.mxu1 }
 0x1c7   : > { %v1737_v17 = vadd.f32 %v1318_v16, %v1667_v44  ;;  %826 = vmax.xlane.f32.xlu0 %v1733_v15 }
 0x1c8   : > { %v730_v18 = vpop.f32.mrf.mxu1 }
 0x1c9   : > { %828 = vmax.xlane.f32.xlu1 %v1737_v17  ;;  %v1745_v21 = vadd.f32 %v1667_v44, %v730_v18 }
 0x1ca   : > { %v1321_v20 = vpop.f32.mrf.mxu1 }
 0x1cb   : > { %822 = vmax.xlane.f32.xlu0 %v1741_v19  ;;  %v1749_v23 = vadd.f32 %v1321_v20, %v1667_v44 }
 0x1cc   : > { %v743_v22 = vpop.f32.mrf.mxu1 }
 0x1cd   : > { %824 = vmax.xlane.f32.xlu1 %v1745_v21  ;;  %v1757_v27 = vadd.f32 %v1667_v44, %v743_v22 }
 0x1ce   : > { %v1322_v24 = vpop.f32.mrf.mxu1 }
 0x1cf   : > { %v1753_v25 = vadd.f32 %v1322_v24, %v1667_v44  ;;  %834 = vmax.xlane.f32.xlu0 %v1749_v23 }
 0x1d0   : > { %v746_v26 = vpop.f32.mrf.mxu1 }
 0x1d1   : > { %836 = vmax.xlane.f32.xlu1 %v1753_v25  ;;  %v1761_v29 = vadd.f32 %v1667_v44, %v746_v26 }
 0x1d2   : > { %v1325_v28 = vpop.f32.mrf.mxu1 }
 0x1d3   : > { %830 = vmax.xlane.f32.xlu0 %v1757_v27  ;;  %v1765_v31 = vadd.f32 %v1325_v28, %v1667_v44 }
 0x1d4   : > { %v759_v30 = vpop.f32.mrf.mxu1 }
 0x1d5   : > { %832 = vmax.xlane.f32.xlu1 %v1761_v29  ;;  %v1773_v35 = vadd.f32 %v1667_v44, %v759_v30 }
 0x1d6   : > { %v1326_v32 = vpop.f32.mrf.mxu1 }
 0x1d7   : > { %v1769_v33 = vadd.f32 %v1326_v32, %v1667_v44  ;;  %842 = vmax.xlane.f32.xlu0 %v1765_v31 }
 0x1d8   : > { %v762_v34 = vpop.f32.mrf.mxu1 }
 0x1d9   : > { %844 = vmax.xlane.f32.xlu1 %v1769_v33  ;;  %v1777_v37 = vadd.f32 %v1667_v44, %v762_v34 }
 0x1da   : > { %v1329_v36 = vpop.f32.mrf.mxu1 }
 0x1db   : > { %838 = vmax.xlane.f32.xlu0 %v1773_v35  ;;  %v1786_v42 = vadd.f32 %v1329_v36, %v1667_v44 }
 0x1dc   : > { %v775_v38 = vpop.f32.mrf.mxu1 }
 0x1dd   : > { %v1781_v39 = vadd.f32 %v1667_v44, %v775_v38  ;;  %840 = vmax.xlane.f32.xlu1 %v1777_v37 }
 0x1de   : > { %v1330_v40 = vpop.f32.mrf.mxu1 }
 0x1df   : > { %846 = vmax.xlane.f32.xlu0 %v1781_v39  ;;  %v1794_v45 = vadd.f32 %v1330_v40, %v1667_v44 }
 0x1e0   : > { %v778_v41 = vpop.f32.mrf.mxu1 }
 0x1e1   : > { %v1789_v43 = vadd.f32 %v1667_v44, %v778_v41 }
 0x1e3   : > { %848 = vmax.xlane.f32.xlu1 %v1789_v43  ;;  %850 = vmax.xlane.f32.xlu0 %v1786_v42 }
 0x1e7   : > { %852 = vmax.xlane.f32.xlu1 %v1794_v45 }
 0x22e   : > { %v795_v47 = vpop.xlane.xlu1 %794 }
 0x22f   : > { %v856_v48 = vsub.f32 %v1670_v46, %v795_v47 }
 0x230   : > { %v791_v50 = vpop.xlane.xlu0 %790 }
 0x231   : > { %v890_v52 = vmul.f32 1.442695, %v856_v48  ;;  %v854_v53 = vsub.f32 %v1673_v60, %v791_v50 }
 0x232   : > { %v797_v55 = vpop.xlane.xlu1 %796 }
 0x233   : > { %1365 = vpow2.f32 %v890_v52  ;;  %v886_v57 = vmul.f32 1.442695, %v854_v53  ;;  %v857_v59 = vsub.f32 %v1677_v49, %v797_v55 }
 0x234   : > { %v793_v62 = vpop.xlane.xlu0 %792 }
 0x235   : > { %v892_v0 = vmul.f32 1.442695, %v857_v59  ;;  %v855_v2 = vsub.f32 %v1681_v51, %v793_v62  ;;  %1367 = vpow2.f32 %v886_v57 }
 0x237   : > { %1369 = vpow2.f32 %v892_v0  ;;  %v888_v44 = vmul.f32 1.442695, %v855_v2 }
 0x238   : > { %v803_v4 = vpop.xlane.xlu0 %802 }
 0x239   : > { %v860_v6 = vsub.f32 %v1686_v54, %v803_v4  ;;  %1371 = vpow2.f32 %v888_v44 }
 0x23a   : > { %v805_v46 = vpop.xlane.xlu1 %804 }
 0x23b   : > { %v898_v8 = vmul.f32 1.442695, %v860_v6  ;;  %v861_v60 = vsub.f32 %v1689_v56, %v805_v46 }
 0x23c   : > { %v799_v10 = vpop.xlane.xlu0 %798 }
 0x23d   : > { %1373 = vpow2.f32 %v898_v8  ;;  %v900_v12 = vmul.f32 1.442695, %v861_v60  ;;  %v858_v49 = vsub.f32 %v1693_v58, %v799_v10 }
 0x23e   : > { %v801_v14 = vpop.xlane.xlu1 %800 }
 0x23f   : > { %1375 = vpow2.f32 %v900_v12  ;;  %v894_v16 = vmul.f32 1.442695, %v858_v49  ;;  %v859_v51 = vsub.f32 %v1697_v61, %v801_v14 }
 0x240   : > { %v1805_v18 = vpop.eup %1365  ;;  %v811_v20 = vpop.xlane.xlu0 %810 }
 0x241   : > { %1377 = vpow2.f32 %v894_v16  ;;  %v896_v54 = vmul.f32 1.442695, %v859_v51  ;;  %v864_v22 = vsub.f32 %v1701_v63, %v811_v20  ;;  %954 = vadd.xlane.f32.xlu0 %v1805_v18 }
 0x242   : > { %v813_v56 = vpop.xlane.xlu1 %812  ;;  %v1809_v24 = vpop.eup %1367 }
 0x243   : > { %1379 = vpow2.f32 %v896_v54  ;;  %v906_v26 = vmul.f32 1.442695, %v864_v22  ;;  %v865_v58 = vsub.f32 %v1705_v1, %v813_v56 }
 0x244   : > { %v1812_v28 = vpop.eup %1369  ;;  %v807_v30 = vpop.xlane.xlu0 %806 }
 0x245   : > { %1381 = vpow2.f32 %v906_v26  ;;  %v908_v61 = vmul.f32 1.442695, %v865_v58  ;;  %v862_v32 = vsub.f32 %v1709_v3, %v807_v30  ;;  %956 = vadd.xlane.f32.xlu1 %v1812_v28  ;;  %950 = vadd.xlane.f32.xlu0 %v1809_v24 }
 0x246   : > { %v809_v63 = vpop.xlane.xlu1 %808  ;;  %v1818_v38 = vpop.eup %1371 }
 0x247   : > { %1383 = vpow2.f32 %v908_v61  ;;  %v902_v34 = vmul.f32 1.442695, %v862_v32  ;;  %v863_v36 = vsub.f32 %v1713_v5, %v809_v63 }
 0x248   : > { %v819_v40 = vpop.xlane.xlu0 %818 }
 0x249   : > { %1385 = vpow2.f32 %v902_v34  ;;  %v904_v1 = vmul.f32 1.442695, %v863_v36  ;;  %v868_v41 = vsub.f32 %v1717_v7, %v819_v40  ;;  %952 = vadd.xlane.f32.xlu1 %v1818_v38 }
 0x24a   : > { %v1822_v47 = vpop.eup %1373  ;;  %v821_v3 = vpop.xlane.xlu1 %820 }
 0x24b   : > { %1387 = vpow2.f32 %v904_v1  ;;  %v914_v48 = vmul.f32 1.442695, %v868_v41  ;;  %v869_v50 = vsub.f32 %v1721_v9, %v821_v3  ;;  %962 = vadd.xlane.f32.xlu0 %v1822_v47 }
 0x24c   : > { %v1826_v52 = vpop.eup %1375  ;;  %v815_v5 = vpop.xlane.xlu0 %814 }
 0x24d   : > { %1389 = vpow2.f32 %v914_v48  ;;  %v916_v53 = vmul.f32 1.442695, %v869_v50  ;;  %v866_v55 = vsub.f32 %v1725_v11, %v815_v5  ;;  %964 = vadd.xlane.f32.xlu1 %v1826_v52 }
 0x24e   : > { %v1830_v7 = vpop.eup %1377  ;;  %v817_v57 = vpop.xlane.xlu1 %816 }
 0x24f   : > { %1391 = vpow2.f32 %v916_v53  ;;  %v910_v59 = vmul.f32 1.442695, %v866_v55  ;;  %v867_v62 = vsub.f32 %v1729_v13, %v817_v57  ;;  %958 = vadd.xlane.f32.xlu0 %v1830_v7 }
 0x250   : > { %v1834_v9 = vpop.eup %1379  ;;  %v827_v0 = vpop.xlane.xlu0 %826 }
 0x251   : > { %1393 = vpow2.f32 %v910_v59  ;;  %v912_v2 = vmul.f32 1.442695, %v867_v62  ;;  %v872_v44 = vsub.f32 %v1733_v15, %v827_v0  ;;  %960 = vadd.xlane.f32.xlu1 %v1834_v9 }
 0x252   : > { %v1838_v11 = vpop.eup %1381  ;;  %v829_v4 = vpop.xlane.xlu1 %828 }
 0x253   : > { %1395 = vpow2.f32 %v912_v2  ;;  %v922_v6 = vmul.f32 1.442695, %v872_v44  ;;  %v873_v46 = vsub.f32 %v1737_v17, %v829_v4  ;;  %970 = vadd.xlane.f32.xlu0 %v1838_v11 }
 0x254   : > { %v1842_v13 = vpop.eup %1383  ;;  %v823_v8 = vpop.xlane.xlu0 %822 }
 0x255   : > { %1397 = vpow2.f32 %v922_v6  ;;  %v924_v60 = vmul.f32 1.442695, %v873_v46  ;;  %v870_v10 = vsub.f32 %v1741_v19, %v823_v8  ;;  %972 = vadd.xlane.f32.xlu1 %v1842_v13 }
 0x256   : > { %v1846_v15 = vpop.eup %1385  ;;  %v825_v12 = vpop.xlane.xlu1 %824 }
 0x257   : > { %1399 = vpow2.f32 %v924_v60  ;;  %v918_v49 = vmul.f32 1.442695, %v870_v10  ;;  %v871_v14 = vsub.f32 %v1745_v21, %v825_v12  ;;  %966 = vadd.xlane.f32.xlu0 %v1846_v15 }
 0x258   : > { %v1850_v17 = vpop.eup %1387  ;;  %v835_v16 = vpop.xlane.xlu0 %834 }
 0x259   : > { %1401 = vpow2.f32 %v918_v49  ;;  %v920_v51 = vmul.f32 1.442695, %v871_v14  ;;  %v876_v20 = vsub.f32 %v1749_v23, %v835_v16  ;;  %968 = vadd.xlane.f32.xlu1 %v1850_v17 }
 0x25a   : > { %v1854_v19 = vpop.eup %1389  ;;  %v837_v54 = vpop.xlane.xlu1 %836 }
 0x25b   : > { %1403 = vpow2.f32 %v920_v51  ;;  %v930_v22 = vmul.f32 1.442695, %v876_v20  ;;  %v877_v56 = vsub.f32 %v1753_v25, %v837_v54  ;;  %978 = vadd.xlane.f32.xlu0 %v1854_v19 }
 0x25c   : > { %v1858_v21 = vpop.eup %1391  ;;  %v831_v26 = vpop.xlane.xlu0 %830 }
 0x25d   : > { %1405 = vpow2.f32 %v930_v22  ;;  %v932_v58 = vmul.f32 1.442695, %v877_v56  ;;  %v874_v30 = vsub.f32 %v1757_v27, %v831_v26  ;;  %980 = vadd.xlane.f32.xlu1 %v1858_v21 }
 0x25e   : > { %v1862_v23 = vpop.eup %1393  ;;  %v833_v61 = vpop.xlane.xlu1 %832 }
 0x25f   : > { %1407 = vpow2.f32 %v932_v58  ;;  %v926_v32 = vmul.f32 1.442695, %v874_v30  ;;  %v875_v63 = vsub.f32 %v1761_v29, %v833_v61  ;;  %974 = vadd.xlane.f32.xlu0 %v1862_v23 }
 0x260   : > { %v1866_v25 = vpop.eup %1395  ;;  %v843_v34 = vpop.xlane.xlu0 %842 }
 0x261   : > { %1409 = vpow2.f32 %v926_v32  ;;  %v928_v36 = vmul.f32 1.442695, %v875_v63  ;;  %v880_v40 = vsub.f32 %v1765_v31, %v843_v34  ;;  %976 = vadd.xlane.f32.xlu1 %v1866_v25 }
 0x262   : > { %v1870_v27 = vpop.eup %1397  ;;  %v845_v1 = vpop.xlane.xlu1 %844 }
 0x263   : > { %1411 = vpow2.f32 %v928_v36  ;;  %v938_v41 = vmul.f32 1.442695, %v880_v40  ;;  %v881_v3 = vsub.f32 %v1769_v33, %v845_v1  ;;  %986 = vadd.xlane.f32.xlu0 %v1870_v27 }
 0x264   : > { %v1874_v29 = vpop.eup %1399  ;;  %v839_v48 = vpop.xlane.xlu0 %838 }
 0x265   : > { %1413 = vpow2.f32 %v938_v41  ;;  %v940_v50 = vmul.f32 1.442695, %v881_v3  ;;  %v878_v5 = vsub.f32 %v1773_v35, %v839_v48  ;;  %988 = vadd.xlane.f32.xlu1 %v1874_v29 }
 0x266   : > { %v1878_v31 = vpop.eup %1401  ;;  %v841_v53 = vpop.xlane.xlu1 %840 }
 0x267   : > { %1415 = vpow2.f32 %v940_v50  ;;  %v934_v55 = vmul.f32 1.442695, %v878_v5  ;;  %v879_v57 = vsub.f32 %v1777_v37, %v841_v53  ;;  %982 = vadd.xlane.f32.xlu0 %v1878_v31 }
 0x268   : > { %v1882_v33 = vpop.eup %1403  ;;  %v847_v59 = vpop.xlane.xlu0 %846 }
 0x269   : > { %1417 = vpow2.f32 %v934_v55  ;;  %v936_v62 = vmul.f32 1.442695, %v879_v57  ;;  %v882_v0 = vsub.f32 %v1781_v39, %v847_v59  ;;  %984 = vadd.xlane.f32.xlu1 %v1882_v33 }
 0x26a   : > { %v1886_v35 = vpop.eup %1405 }
 0x26b   : > { %1419 = vpow2.f32 %v936_v62  ;;  %v942_v2 = vmul.f32 1.442695, %v882_v0  ;;  %994 = vadd.xlane.f32.xlu0 %v1886_v35 }
 0x26c   : > { %v1889_v44 = vpop.eup %1407  ;;  %v849_v37 = vpop.xlane.xlu1 %848 }
 0x26d   : > { %v851_v4 = vpop.xlane.xlu0 %850  ;;  %1421 = vpow2.f32 %v942_v2  ;;  %v883_v6 = vsub.f32 %v1789_v43, %v849_v37  ;;  %996 = vadd.xlane.f32.xlu1 %v1889_v44 }
 0x26e   : > { %v884_v46 = vsub.f32 %v1786_v42, %v851_v4  ;;  %v1894_v39 = vpop.eup %1409 }
 0x26f   : > { %v944_v8 = vmul.f32 1.442695, %v883_v6  ;;  %990 = vadd.xlane.f32.xlu0 %v1894_v39 }
 0x270   : > { %v946_v60 = vmul.f32 1.442695, %v884_v46  ;;  %v1897_v10 = vpop.eup %1411  ;;  %v853_v12 = vpop.xlane.xlu1 %852 }
 0x271   : > { %1423 = vpow2.f32 %v944_v8  ;;  %v885_v49 = vsub.f32 %v1794_v45, %v853_v12  ;;  %992 = vadd.xlane.f32.xlu1 %v1897_v10 }
 0x272   : > { %v1901_v14 = vpop.eup %1413  ;;  %1425 = vpow2.f32 %v946_v60 }
 0x273   : > { %v948_v42 = vmul.f32 1.442695, %v885_v49  ;;  %1002 = vadd.xlane.f32.xlu0 %v1901_v14 }
 0x274   : > { %v1904_v43 = vpop.eup %1415 }
 0x275   : > { %1427 = vpow2.f32 %v948_v42  ;;  %1004 = vadd.xlane.f32.xlu1 %v1904_v43 }
 0x276   : > { %v1907_v16 = vpop.eup %1417 }
 0x277   : > { %998 = vadd.xlane.f32.xlu0 %v1907_v16 }
 0x278   : > { %v1910_v51 = vpop.eup %1419 }
 0x279   : > { %1000 = vadd.xlane.f32.xlu1 %v1910_v51 }
 0x27a   : > { %v1913_v45 = vpop.eup %1421 }
 0x27b   : > { %1006 = vadd.xlane.f32.xlu0 %v1913_v45 }
 0x27e   : > { %v1916_v20 = vpop.eup %1423 }
 0x27f   : > { %v1918_v54 = vpop.eup %1425  ;;  %1008 = vadd.xlane.f32.xlu1 %v1916_v20 }
 0x280   : > { %1010 = vadd.xlane.f32.xlu0 %v1918_v54 }
 0x282   : > { %v1922_v22 = vpop.eup %1427 }
 0x283   : > { %1012 = vadd.xlane.f32.xlu1 %v1922_v22 }
 0x2ca   : > { %v955_v56 = vpop.xlane.xlu0 %954 }
 0x2cb   : > { %1429 = vrcp.f32 %v955_v56 }
 0x2ce   : > { %v957_v26 = vpop.xlane.xlu1 %956  ;;  %v951_v58 = vpop.xlane.xlu0 %950 }
 0x2cf   : > { %1431 = vrcp.f32 %v957_v26 }
 0x2d0   : > { %1433 = vrcp.f32 %v951_v58 }
 0x2d2   : > { %v953_v30 = vpop.xlane.xlu1 %952 }
 0x2d3   : > { %1435 = vrcp.f32 %v953_v30 }
 0x2d4   : > { %v963_v61 = vpop.xlane.xlu0 %962 }
 0x2d5   : > { %1437 = vrcp.f32 %v963_v61 }
 0x2d6   : > { %v965_v32 = vpop.xlane.xlu1 %964 }
 0x2d7   : > { %1439 = vrcp.f32 %v965_v32 }
 0x2d8   : > { %v1430_v63 = vpop.eup %1429  ;;  %v959_v34 = vpop.xlane.xlu0 %958 }
 0x2d9   : > { %v1048_v36 = vmul.f32 %v1430_v63, %v1805_v18  ;;  %1441 = vrcp.f32 %v959_v34 }
 0x2da   : > { %v961_v40 = vpop.xlane.xlu1 %960 }
 0x2db   : > { %1080 = vst [vmem:[%s1930_s28 + $0x10] sm:$0xff] %v1048_v36  ;;  %1443 = vrcp.f32 %v961_v40 }
 0x2dc   : > { %v1432_v1 = vpop.eup %1431  ;;  %v971_v41 = vpop.xlane.xlu0 %970 }
 0x2dd   : > { %v1434_v3 = vpop.eup %1433  ;;  %v1049_v48 = vmul.f32 %v1432_v1, %v1812_v28  ;;  %1445 = vrcp.f32 %v971_v41 }
 0x2de   : > { %v1046_v50 = vmul.f32 %v1434_v3, %v1809_v24  ;;  %v973_v5 = vpop.xlane.xlu1 %972 }
 0x2df   : > { %1081 = vst [vmem:[%s1930_s28 + $0x18] sm:$0xff] %v1049_v48  ;;  %1447 = vrcp.f32 %v973_v5 }
 0x2e0   : > { %v1436_v53 = vpop.eup %1435  ;;  %1078 = vst [vmem:[%s1930_s28] sm:$0xff] %v1046_v50  ;;  %v967_v18 = vpop.xlane.xlu0 %966 }
 0x2e1   : > { %v1047_v55 = vmul.f32 %v1436_v53, %v1818_v38  ;;  %1449 = vrcp.f32 %v967_v18 }
 0x2e2   : > { %v1438_v57 = vpop.eup %1437  ;;  %v969_v59 = vpop.xlane.xlu1 %968 }
 0x2e3   : > { %1079 = vst [vmem:[%s1930_s28 + $0x8] sm:$0xff] %v1047_v55  ;;  %v1052_v28 = vmul.f32 %v1438_v57, %v1822_v47  ;;  %1451 = vrcp.f32 %v969_v59 }
 0x2e4   : > { %v1440_v62 = vpop.eup %1439  ;;  %v979_v24 = vpop.xlane.xlu0 %978 }
 0x2e5   : > { %1084 = vst [vmem:[%s1930_s28 + $0x30] sm:$0xff] %v1052_v28  ;;  %v1053_v0 = vmul.f32 %v1440_v62, %v1826_v52  ;;  %1453 = vrcp.f32 %v979_v24 }
 0x2e6   : > { %v1442_v2 = vpop.eup %1441  ;;  %v981_v37 = vpop.xlane.xlu1 %980 }
 0x2e7   : > { %1085 = vst [vmem:[%s1930_s28 + $0x38] sm:$0xff] %v1053_v0  ;;  %v1050_v38 = vmul.f32 %v1442_v2, %v1830_v7  ;;  %1455 = vrcp.f32 %v981_v37 }
 0x2e8   : > { %v1444_v4 = vpop.eup %1443  ;;  %v975_v6 = vpop.xlane.xlu0 %974 }
 0x2e9   : > { %1082 = vst [vmem:[%s1930_s28 + $0x20] sm:$0xff] %v1050_v38  ;;  %v1051_v47 = vmul.f32 %v1444_v4, %v1834_v9  ;;  %1457 = vrcp.f32 %v975_v6 }
 0x2ea   : > { %v1446_v46 = vpop.eup %1445  ;;  %v977_v8 = vpop.xlane.xlu1 %976 }
 0x2eb   : > { %1083 = vst [vmem:[%s1930_s28 + $0x28] sm:$0xff] %v1051_v47  ;;  %v1056_v52 = vmul.f32 %v1446_v46, %v1838_v11  ;;  %1459 = vrcp.f32 %v977_v8 }
 0x2ec   : > { %v1448_v60 = vpop.eup %1447  ;;  %v987_v12 = vpop.xlane.xlu0 %986 }
 0x2ed   : > { %1088 = vst [vmem:[%s1930_s28 + $0x50] sm:$0xff] %v1056_v52  ;;  %v1057_v7 = vmul.f32 %v1448_v60, %v1842_v13  ;;  %1461 = vrcp.f32 %v987_v12 }
 0x2ee   : > { %v1450_v49 = vpop.eup %1449  ;;  %v989_v42 = vpop.xlane.xlu1 %988 }
 0x2ef   : > { %1089 = vst [vmem:[%s1930_s28 + $0x58] sm:$0xff] %v1057_v7  ;;  %v1054_v9 = vmul.f32 %v1450_v49, %v1846_v15  ;;  %1463 = vrcp.f32 %v989_v42 }
 0x2f0   : > { %v1452_v56 = vpop.eup %1451  ;;  %v983_v26 = vpop.xlane.xlu0 %982 }
 0x2f1   : > { %1086 = vst [vmem:[%s1930_s28 + $0x40] sm:$0xff] %v1054_v9  ;;  %v1055_v11 = vmul.f32 %v1452_v56, %v1850_v17  ;;  %1465 = vrcp.f32 %v983_v26 }
 0x2f2   : > { %v1454_v58 = vpop.eup %1453  ;;  %v985_v30 = vpop.xlane.xlu1 %984 }
 0x2f3   : > { %1087 = vst [vmem:[%s1930_s28 + $0x48] sm:$0xff] %v1055_v11  ;;  %v1060_v13 = vmul.f32 %v1454_v58, %v1854_v19  ;;  %1467 = vrcp.f32 %v985_v30 }
 0x2f4   : > { %v1456_v61 = vpop.eup %1455  ;;  %v995_v32 = vpop.xlane.xlu0 %994 }
 0x2f5   : > { %1092 = vst [vmem:[%s1930_s28 + $0x70] sm:$0xff] %v1060_v13  ;;  %v1061_v15 = vmul.f32 %v1456_v61, %v1858_v21  ;;  %1469 = vrcp.f32 %v995_v32 }
 0x2f6   : > { %v1458_v63 = vpop.eup %1457  ;;  %v997_v34 = vpop.xlane.xlu1 %996 }
 0x2f7   : > { %1093 = vst [vmem:[%s1930_s28 + $0x78] sm:$0xff] %v1061_v15  ;;  %v1058_v17 = vmul.f32 %v1458_v63, %v1862_v23  ;;  %1471 = vrcp.f32 %v997_v34 }
 0x2f8   : > { %v1460_v36 = vpop.eup %1459  ;;  %v991_v40 = vpop.xlane.xlu0 %990 }
 0x2f9   : > { %1090 = vst [vmem:[%s1930_s28 + $0x60] sm:$0xff] %v1058_v17  ;;  %v1059_v19 = vmul.f32 %v1460_v36, %v1866_v25  ;;  %1473 = vrcp.f32 %v991_v40 }
 0x2fa   : > { %v1462_v1 = vpop.eup %1461  ;;  %v993_v41 = vpop.xlane.xlu1 %992 }
 0x2fb   : > { %1091 = vst [vmem:[%s1930_s28 + $0x68] sm:$0xff] %v1059_v19  ;;  %v1064_v21 = vmul.f32 %v1462_v1, %v1870_v27  ;;  %1475 = vrcp.f32 %v993_v41 }
 0x2fc   : > { %v1464_v3 = vpop.eup %1463  ;;  %v1003_v48 = vpop.xlane.xlu0 %1002 }
 0x2fd   : > { %1096 = vst [vmem:[%s1930_s28 + $0x90] sm:$0xff] %v1064_v21  ;;  %v1065_v23 = vmul.f32 %v1464_v3, %v1874_v29  ;;  %1477 = vrcp.f32 %v1003_v48 }
 0x2fe   : > { %v1466_v50 = vpop.eup %1465  ;;  %v1005_v5 = vpop.xlane.xlu1 %1004 }
 0x2ff   : > { %1097 = vst [vmem:[%s1930_s28 + $0x98] sm:$0xff] %v1065_v23  ;;  %v1062_v25 = vmul.f32 %v1466_v50, %v1878_v31  ;;  %1479 = vrcp.f32 %v1005_v5 }
 0x300   : > { %v1468_v53 = vpop.eup %1467  ;;  %v999_v18 = vpop.xlane.xlu0 %998 }
 0x301   : > { %1094 = vst [vmem:[%s1930_s28 + $0x80] sm:$0xff] %v1062_v25  ;;  %v1063_v27 = vmul.f32 %v1468_v53, %v1882_v33  ;;  %1481 = vrcp.f32 %v999_v18 }
 0x302   : > { %v1470_v55 = vpop.eup %1469  ;;  %v1001_v57 = vpop.xlane.xlu1 %1000 }
 0x303   : > { %1095 = vst [vmem:[%s1930_s28 + $0x88] sm:$0xff] %v1063_v27  ;;  %v1068_v29 = vmul.f32 %v1470_v55, %v1886_v35  ;;  %1483 = vrcp.f32 %v1001_v57 }
 0x304   : > { %v1472_v59 = vpop.eup %1471  ;;  %v1007_v28 = vpop.xlane.xlu0 %1006 }
 0x305   : > { %1100 = vst [vmem:[%s1930_s28 + $0xb0] sm:$0xff] %v1068_v29  ;;  %v1069_v31 = vmul.f32 %v1472_v59, %v1889_v44  ;;  %1485 = vrcp.f32 %v1007_v28 }
 0x306   : > { %v1474_v62 = vpop.eup %1473 }
 0x307   : > { %1101 = vst [vmem:[%s1930_s28 + $0xb8] sm:$0xff] %v1069_v31  ;;  %v1066_v33 = vmul.f32 %v1474_v62, %v1894_v39 }
 0x308   : > { %v1476_v24 = vpop.eup %1475  ;;  %v1009_v0 = vpop.xlane.xlu1 %1008 }
 0x309   : > { %1098 = vst [vmem:[%s1930_s28 + $0xa0] sm:$0xff] %v1066_v33  ;;  %v1067_v2 = vmul.f32 %v1476_v24, %v1897_v10  ;;  %1487 = vrcp.f32 %v1009_v0  ;;  %v1011_v35 = vpop.xlane.xlu0 %1010 }
 0x30a   : > { %v1478_v37 = vpop.eup %1477  ;;  %1489 = vrcp.f32 %v1011_v35 }
 0x30b   : > { %1099 = vst [vmem:[%s1930_s28 + $0xa8] sm:$0xff] %v1067_v2  ;;  %v1072_v44 = vmul.f32 %v1478_v37, %v1901_v14 }
 0x30c   : > { %v1480_v38 = vpop.eup %1479  ;;  %v1013_v4 = vpop.xlane.xlu1 %1012 }
 0x30d   : > { %1104 = vst [vmem:[%s1930_s28 + $0xd0] sm:$0xff] %v1072_v44  ;;  %v1073_v39 = vmul.f32 %v1480_v38, %v1904_v43  ;;  %1491 = vrcp.f32 %v1013_v4 }
 0x30e   : > { %v1482_v6 = vpop.eup %1481 }
 0x30f   : > { %1105 = vst [vmem:[%s1930_s28 + $0xd8] sm:$0xff] %v1073_v39  ;;  %v1070_v10 = vmul.f32 %v1482_v6, %v1907_v16 }
 0x310   : > { %v1484_v47 = vpop.eup %1483 }
 0x311   : > { %1102 = vst [vmem:[%s1930_s28 + $0xc0] sm:$0xff] %v1070_v10  ;;  %v1071_v46 = vmul.f32 %v1484_v47, %v1910_v51 }
 0x312   : > { %v1486_v8 = vpop.eup %1485 }
 0x313   : > { %1103 = vst [vmem:[%s1930_s28 + $0xc8] sm:$0xff] %v1071_v46  ;;  %v1074_v14 = vmul.f32 %v1486_v8, %v1913_v45 }
 0x315   : > { %1106 = vst [vmem:[%s1930_s28 + $0xe0] sm:$0xff] %v1074_v14 }
 0x316   : > { %v1488_v52 = vpop.eup %1487 }
 0x317   : > { %v1490_v60 = vpop.eup %1489  ;;  %v1075_v43 = vmul.f32 %v1488_v52, %v1916_v20 }
 0x318   : > { %v1076_v12 = vmul.f32 %v1490_v60, %v1918_v54 }
 0x319   : > { %1107 = vst [vmem:[%s1930_s28 + $0xe8] sm:$0xff] %v1075_v43 }
 0x31a   : > { %v1492_v7 = vpop.eup %1491  ;;  %1108 = vst [vmem:[%s1930_s28 + $0xf0] sm:$0xff] %v1076_v12 }
 0x31b   : > { %v1077_v16 = vmul.f32 %v1492_v7, %v1922_v22 }
 0x31d   : > { %1109 = vst [vmem:[%s1930_s28 + $0xf8] sm:$0xff] %v1077_v16 }
 0x31e PF: > { %s15_s18 = sadd.s32 1, %s1499_s18  }
 0x31f   : > { %p12_p4 = scmp.ge.s32.totalorder %s15_s18, 4  }
 0x321   :  { %14 = sbr.rel (!%p12_p4) target bundleno = 1 (0x1), region = 70 }

</bundles_post_ra>
